<compile_context>
chip_gen: v5e
topology: v5e:2x2
jax: 0.10.0
libtpu: 0.0.40
codegen_flags: <defaults>
</compile_context>

<pallas_src>
import functools
import math

import jax
import jax.numpy as jnp
from jax.experimental import pallas as pl
from jax.experimental.pallas import tpu as pltpu

EPS = 1e-8


def _wasym_loss_kernel(x_ref, y_ref, out_ref, *, eps, log_eps, n_valid,
                       tile_m, n_classes, mask_rows):
    """One grid step: (tile_m, C) rows -> (8, C) lane-dense partial-sum tile.

    The (1, C) row-reduced partial is broadcast across 8 sublanes so the store
    is a full unmasked tile; the wrapper divides the grand total by 8 (exact
    in f32 since 8 is a power of two).
    """
    x = x_ref[...].astype(jnp.float32)
    y = y_ref[...].astype(jnp.float32)

    # Numerically-stable softmax / log-softmax along the class dim.
    m = jnp.max(x, axis=-1, keepdims=True)
    xm = x - m
    e = jnp.exp(xm)
    s = jnp.sum(e, axis=-1, keepdims=True)
    # approx=False keeps the result bit-close to the jnp reference; the kernel
    # is HBM-bound, so the exact reciprocal is not on the critical path.
    p = e * pl.reciprocal(s, approx=False)      # softmax(x)
    log_p = xm - jnp.log(s)                     # log_softmax(x)

    # y * log(clamp(p, eps)) == y * max(log_p, log(eps))  (log-softmax form
    # saves one full elementwise log per element on the single EUP slot).
    los_pos = y * jnp.maximum(log_p, jnp.float32(log_eps))
    los_neg = (1.0 - y) * jnp.log(jnp.maximum(1.0 - p, eps))
    # neg_weight = 1 - (1 - p) == p; the torch grad toggle has no fwd effect.
    loss = los_pos + p * los_neg

    if mask_rows:
        row = (jax.lax.broadcasted_iota(jnp.int32, (tile_m, 1), 0)
               + pl.program_id(0) * tile_m)
        loss = jnp.where(row < n_valid, loss, 0.0)

    partial = jnp.sum(loss, axis=0, keepdims=True)           # (1, C)
    out_ref[...] = jnp.broadcast_to(partial, (8, n_classes))


def weighted_asymmetric_loss(x, y, *, eps=EPS, max_tile_m=1024,
                             max_tile_bytes=4 * 1024 * 1024):
    """Pallas implementation of WeightedAsymmetricLoss.forward (weight=None).

    x, y: (N, C) arrays (any float dtype; cast to f32 inside the kernel).
    Returns a float32 scalar:  -mean_over_rows(mean_over_classes(loss)).
    """
    assert x.shape == y.shape and x.ndim == 2
    n, c = x.shape

    # Largest row tile with a single (tile_m, C) f32 buffer under
    # max_tile_bytes (=> <=16 MiB for two double-buffered inputs: fits the
    # scoped-VMEM budget on v5e/v6e/v7x), rounded to a multiple of 8.
    cap = max(8, ((max_tile_bytes // (c * 4)) // 8) * 8)
    tile_m = min(max_tile_m, cap, ((n + 7) // 8) * 8)
    tile_m = max(8, (tile_m // 8) * 8)

    num_blocks = pl.cdiv(n, tile_m)
    n_pad = num_blocks * tile_m
    if n_pad != n:
        x = jnp.pad(x, ((0, n_pad - n), (0, 0)))
        y = jnp.pad(y, ((0, n_pad - n), (0, 0)))

    kernel = functools.partial(
        _wasym_loss_kernel,
        eps=eps, log_eps=math.log(eps), n_valid=n,
        tile_m=tile_m, n_classes=c, mask_rows=(n_pad != n))

    out_bytes = num_blocks * 8 * c * 4
    cost = pl.CostEstimate(
        flops=12 * n * c,
        transcendentals=2 * n * c,
        bytes_accessed=2 * n * c * jnp.dtype(x.dtype).itemsize + out_bytes)

    partials = pl.pallas_call(
        kernel,
        out_shape=jax.ShapeDtypeStruct((num_blocks * 8, c), jnp.float32),
        grid_spec=pltpu.PrefetchScalarGridSpec(
            num_scalar_prefetch=0,
            grid=(num_blocks,),
            in_specs=[
                pl.BlockSpec((tile_m, c), lambda i: (i, 0)),
                pl.BlockSpec((tile_m, c), lambda i: (i, 0)),
            ],
            out_specs=pl.BlockSpec((8, c), lambda i: (i, 0)),
        ),
        compiler_params=pltpu.CompilerParams(
            dimension_semantics=("parallel",),   # independent blocks -> megacore ok
            vmem_limit_bytes=32 * 1024 * 1024,
        ),
        cost_estimate=cost,
    )(x, y)

    total = jnp.sum(partials, dtype=jnp.float32) / 8.0   # undo sublane broadcast
    return -total / jnp.float32(n * c)


def _reference(x, y, eps=EPS):
    p = jax.nn.softmax(x.astype(jnp.float32), axis=-1)
    los_pos = y * jnp.log(jnp.maximum(p, eps))
    los_neg = (1.0 - y) * jnp.log(jnp.maximum(1.0 - p, eps))
    loss = los_pos + p * los_neg
    return -jnp.mean(jnp.mean(loss, axis=-1))


if __name__ == "__main__":
    key = jax.random.PRNGKey(0)
    kx, ky = jax.random.split(key)

    N, C = 16, 128  # small batch of 16 samples, 128 classes
    x = jax.random.normal(kx, (N, C), dtype=jnp.float32)
    y = jax.random.bernoulli(ky, p=0.25, shape=(N, C)).astype(jnp.float32)

    out = weighted_asymmetric_loss(x, y)
    out = jax.block_until_ready(out)

    ref = _reference(x, y)
    assert jnp.allclose(out, ref, rtol=1e-5, atol=1e-6), (out, ref)

    print("KERNEL_OK")
</pallas_src>

<mosaic_0001>
module attributes {stable_mosaic.version = 11 : i64} {
  func.func @_wasym_loss_kernel(%arg0: i32, %arg1: memref<16x128xf32, #tpu.memory_space<vmem>>, %arg2: memref<16x128xf32, #tpu.memory_space<vmem>>, %arg3: memref<8x128xf32, #tpu.memory_space<vmem>>) attributes {dimension_semantics = [#tpu.dimension_semantics<parallel>], iteration_bounds = array<i64: 1>, scalar_prefetch = 0 : i64, scratch_operands = 0 : i64, tpu.core_type = #tpu.core_type<tc>, window_params = [{transform_indices = @transform_0, window_bounds = array<i64: 16, 128>}, {transform_indices = @transform_1, window_bounds = array<i64: 16, 128>}, {transform_indices = @transform_2, window_bounds = array<i64: 8, 128>}]} {
    %c0 = arith.constant 0 : index
    %c0_0 = arith.constant 0 : index
    %0 = vector.load %arg1[%c0, %c0_0] : memref<16x128xf32, #tpu.memory_space<vmem>>, vector<16x128xf32>
    %c0_1 = arith.constant 0 : index
    %c0_2 = arith.constant 0 : index
    %1 = vector.load %arg2[%c0_1, %c0_2] : memref<16x128xf32, #tpu.memory_space<vmem>>, vector<16x128xf32>
    %cst = arith.constant dense<0xFF800000> : vector<16xf32>
    %2 = vector.multi_reduction <maximumf>, %0, %cst [1] : vector<16x128xf32> to vector<16xf32>
    %3 = vector.shape_cast %2 : vector<16xf32> to vector<16x1xf32>
    %4 = vector.broadcast %3 : vector<16x1xf32> to vector<16x128xf32>
    %5 = arith.subf %0, %4 : vector<16x128xf32>
    %6 = math.exp %5 : vector<16x128xf32>
    %cst_3 = arith.constant dense<0.000000e+00> : vector<16xf32>
    %7 = vector.multi_reduction <add>, %6, %cst_3 [1] : vector<16x128xf32> to vector<16xf32>
    %8 = vector.shape_cast %7 : vector<16xf32> to vector<16x1xf32>
    %9 = tpu.reciprocal %8 : vector<16x1xf32> -> vector<16x1xf32>
    %10 = vector.broadcast %9 : vector<16x1xf32> to vector<16x128xf32>
    %11 = arith.mulf %6, %10 : vector<16x128xf32>
    %12 = math.log %8 : vector<16x1xf32>
    %13 = vector.broadcast %12 : vector<16x1xf32> to vector<16x128xf32>
    %14 = arith.subf %5, %13 : vector<16x128xf32>
    %cst_4 = arith.constant -18.420681 : f32
    %15 = vector.broadcast %cst_4 : f32 to vector<16x128xf32>
    %16 = arith.maximumf %14, %15 : vector<16x128xf32>
    %17 = arith.mulf %1, %16 : vector<16x128xf32>
    %cst_5 = arith.constant 1.000000e+00 : f32
    %18 = vector.broadcast %cst_5 : f32 to vector<16x128xf32>
    %19 = arith.subf %18, %1 : vector<16x128xf32>
    %cst_6 = arith.constant 1.000000e+00 : f32
    %20 = vector.broadcast %cst_6 : f32 to vector<16x128xf32>
    %21 = arith.subf %20, %11 : vector<16x128xf32>
    %cst_7 = arith.constant 9.99999993E-9 : f32
    %22 = vector.broadcast %cst_7 : f32 to vector<16x128xf32>
    %23 = arith.maximumf %21, %22 : vector<16x128xf32>
    %24 = math.log %23 : vector<16x128xf32>
    %25 = arith.mulf %19, %24 : vector<16x128xf32>
    %26 = arith.mulf %11, %25 : vector<16x128xf32>
    %27 = arith.addf %17, %26 : vector<16x128xf32>
    %cst_8 = arith.constant dense<0.000000e+00> : vector<128xf32>
    %28 = vector.multi_reduction <add>, %27, %cst_8 [0] : vector<16x128xf32> to vector<128xf32>
    %29 = vector.shape_cast %28 : vector<128xf32> to vector<1x128xf32>
    %30 = vector.shape_cast %29 : vector<1x128xf32> to vector<1x128xf32>
    %31 = vector.broadcast %30 : vector<1x128xf32> to vector<8x128xf32>
    %c0_9 = arith.constant 0 : index
    %c0_10 = arith.constant 0 : index
    %32 = vector.load %arg3[%c0_9, %c0_10] : memref<8x128xf32, #tpu.memory_space<vmem>>, vector<8x128xf32>
    tpu.vector_store %arg3[%c0_9, %c0_10], %31 {strides = array<i32>} : memref<8x128xf32, #tpu.memory_space<vmem>>, vector<8x128xf32>,
    return
  }
  func.func @transform_0(%arg0: i32) -> (i32, i32) {
    %c0_i32 = arith.constant 0 : i32
    %c0_i32_0 = arith.constant 0 : i32
    return %arg0, %c0_i32 : i32, i32
  }
  func.func @transform_1(%arg0: i32) -> (i32, i32) {
    %c0_i32 = arith.constant 0 : i32
    %c0_i32_0 = arith.constant 0 : i32
    return %arg0, %c0_i32 : i32, i32
  }
  func.func @transform_2(%arg0: i32) -> (i32, i32) {
    %c0_i32 = arith.constant 0 : i32
    %c0_i32_0 = arith.constant 0 : i32
    return %arg0, %c0_i32 : i32, i32
  }
}

</mosaic_0001>

<bundles_post_ra>
// kernel: tpu_custom_call.1
= control target key start
LH: loop header
LB: loop body
LE: loop exit
PB: predicated region body
PF: predicated region fallthrough
CT: control target
= control target key end

     0   :  { %7 = vsyncpa [#allocation3], 0  ;;  %s280_s0 = inlined_call_operand.hbm [shape: f32[16,128], index: 0, kind: input, shape index: {}]   ;;  %s281_s1 = inlined_call_operand.hbm [shape: f32[16,128], index: 1, kind: input, shape index: {}]   ;;  %s282_s2 = inlined_call_operand.hbm [shape: f32[8,128], index: 2, kind: output, shape index: {}]  }
   0x1   :  { %8 = vsyncpa [#allocation6], 0 }
   0x2   :  { %9 = vsyncpa [#allocation4], 0  ;;  %s14_s11 = sshll.u32 %s280_s0, 4  ;;  %s243_s12 = smov [#allocation2]   ;;  %s15_s11 = int_to_ptr.hbm [resolvable:$true] %s14_s11 }
   0x3   :  { %s16_s13 = sshll.u32 %s243_s12, 4  ;;  %s27_s16 = sshll.u32 %s281_s1, 4  ;;  %s17_s13 = int_to_ptr.vmem [resolvable:$true] %s16_s13  ;;  %s28_s16 = int_to_ptr.hbm [resolvable:$true] %s27_s16 }
   0x4   :  { %s244_s17 = smov 128   ;;  %s245_s18 = smov 8  }
   0x5   :  { %22 = dma.hbm_to_vmem [thread:$0]  %s15_s11, 256, %s17_s13, [#allocation3], %s244_s17, %s244_s17, %s245_s18  }
   0x6   :  { %s246_s19 = smov [#allocation5]  }
   0x7   :  { %s29_s20 = sshll.u32 %s246_s19, 4  ;;  %s30_s20 = int_to_ptr.vmem [resolvable:$true] %s29_s20 }
   0x8   :  { %35 = dma.hbm_to_vmem [thread:$0]  %s28_s16, 256, %s30_s20, [#allocation6], %s244_s17, %s244_s17, %s245_s18  }
   0x9   :  { %237 = dma.done.wait [#allocation3], 256  }
   0xa   :  { %238 = vsyncadd [#allocation3], 4294967040 }
   0xb   :  { %239 = dma.done.wait [#allocation6], 256  }
   0xc   :  { %240 = vsyncadd [#allocation6], 4294967040  ;;  %v44_v0 = vld [vmem:[#allocation2] sm:$0xff]  ;;  %v45_v1 = vld [vmem:[#allocation2 + $0x8] sm:$0xff]  ;;  %s247_s0 = smov [#allocation7]   ;;  %s133_s23 = sshll.u32 %s282_s2, 4  ;;  %s134_s23 = int_to_ptr.hbm [resolvable:$true] %s133_s23 }
   0xd   :  { %48 = vmax.xlane.f32.xlu0 %v44_v0  ;;  %v46_v43 = vld [vmem:[#allocation5] sm:$0xff]  ;;  %v47_v48 = vld [vmem:[#allocation5 + $0x8] sm:$0xff]  ;;  %s131_s1 = sshll.u32 %s247_s0, 4  ;;  %s132_s1 = int_to_ptr.vmem [resolvable:$true] %s131_s1 }
   0xe   :  { %v102_v44 = vsub.f32 1.0, %v46_v43  ;;  %v103_v49 = vsub.f32 1.0, %v47_v48 }
  0x15   :  { %50 = vmax.xlane.f32.xlu0 %v45_v1 }
  0x80   :  { %v49_v2 = vpop.xlane.xlu0 %48 }
  0x81   :  { %v269_v3 = vsub.f32 %v44_v0, %v49_v2 }
  0x83   :  { %v54_v4 = vmul.f32 1.442695, %v269_v3 }
  0x85   :  { %149 = vpow2.f32 %v54_v4 }
  0x88   :  { %v51_v5 = vpop.xlane.xlu0 %50 }
  0x89   :  { %v272_v6 = vsub.f32 %v45_v1, %v51_v5 }
  0x8b   :  { %v150_v7 = vpop.eup %149  ;;  %v56_v8 = vmul.f32 1.442695, %v272_v6 }
  0x8c   :  { %58 = vadd.xlane.f32.xlu1 %v150_v7 }
  0x8d   :  { %151 = vpow2.f32 %v56_v8 }
  0x93   :  { %v152_v9 = vpop.eup %151 }
  0x94   :  { %60 = vadd.xlane.f32.xlu1 %v152_v9 }
  0xff   :  { %v59_v10 = vpop.xlane.xlu1 %58 }
 0x100   :  { %153 = vrcp.f32 %v59_v10  ;;  %v73_v15 = vand.u32 2147483648, %v59_v10  ;;  %v71_v17 = vand.u32 2147483647, %v59_v10  ;;  %vm67_vm1 = vweird.f32 %v59_v10 }
 0x102   :  { %v74_v20 = vor.u32 1.1754944e-38, %v73_v15  ;;  %vm72_vm3 = vcmp.eq.f32.partialorder %v71_v17, 8.507059e+37 }
 0x106   :  { %v154_v11 = vpop.eup %153 }
 0x107   :  { %v63_v12 = vmul.f32 %v154_v11, %v59_v10  ;;  %v61_v13 = vpop.xlane.xlu1 %60  ;;  %vm68_vm0 = vweird.f32 %v154_v11 }
 0x108   :  { %155 = vrcp.f32 %v61_v13  ;;  %vm69_vm2 = vmor %vm67_vm1, %vm68_vm0  ;;  %v87_v26 = vand.u32 2147483648, %v61_v13  ;;  %v85_v29 = vand.u32 2147483647, %v61_v13  ;;  %vm81_vm5 = vweird.f32 %v61_v13 }
 0x109   :  { %v64_v14 = vsub.f32 1.0, %v63_v12  ;;  %157 = vlog2.f32 %v59_v10 }
 0x10a   :  { %159 = vlog2.f32 %v61_v13  ;;  %v88_v32 = vor.u32 1.1754944e-38, %v87_v26  ;;  %vm86_vm7 = vcmp.eq.f32.partialorder %v85_v29, 8.507059e+37 }
 0x10b   :  { %v65_v16 = vmul.f32 %v154_v11, %v64_v14 }
 0x10d   :  { %v66_v18 = vadd.f32 %v154_v11, %v65_v16 }
 0x10e   :  { %v156_v19 = vpop.eup %155 }
 0x10f   :  { %v70_v21 = vsel %vm69_vm2, %v154_v11, %v66_v18  ;;  %v77_v22 = vmul.f32 %v156_v19, %v61_v13  ;;  %vm82_vm4 = vweird.f32 %v156_v19  ;;  %v158_v36 = vpop.eup %157 }
 0x110   :  { %v75_v23 = vsel %vm72_vm3, %v74_v20, %v70_v21  ;;  %vm83_vm6 = vmor %vm81_vm5, %vm82_vm4  ;;  %v160_v37 = vpop.eup %159  ;;  %v93_v41 = vmul.f32 0.6931472, %v158_v36 }
 0x111   :  { %v90_v24 = vmul.f32 %v150_v7, %v75_v23  ;;  %v78_v25 = vsub.f32 1.0, %v77_v22  ;;  %v95_v42 = vmul.f32 0.6931472, %v160_v37 }
 0x112   :  { %v96_v46 = vsub.f32 %v269_v3, %v93_v41 }
 0x113   :  { %v104_v27 = vsub.f32 1.0, %v90_v24  ;;  %v79_v28 = vmul.f32 %v156_v19, %v78_v25  ;;  %v97_v47 = vsub.f32 %v272_v6, %v95_v42 }
 0x114   :  { %v98_v52 = vmax.f32 %v96_v46, -18.420681 }
 0x115   :  { %v106_v30 = vmax.f32 %v104_v27, 1e-08  ;;  %v80_v31 = vadd.f32 %v156_v19, %v79_v28  ;;  %v99_v53 = vmax.f32 %v97_v47, -18.420681 }
 0x116   :  { %v100_v59 = vmul.f32 %v98_v52, %v46_v43 }
 0x117   :  { %161 = vlog2.f32 %v106_v30  ;;  %v84_v33 = vsel %vm83_vm6, %v156_v19, %v80_v31  ;;  %v101_v57 = vmul.f32 %v99_v53, %v47_v48 }
 0x118   :  { %v89_v34 = vsel %vm86_vm7, %v88_v32, %v84_v33 }
 0x119   :  { %v91_v35 = vmul.f32 %v152_v9, %v89_v34 }
 0x11b   :  { %v105_v38 = vsub.f32 1.0, %v91_v35 }
 0x11d   :  { %v162_v39 = vpop.eup %161  ;;  %v107_v40 = vmax.f32 %v105_v38, 1e-08 }
 0x11e   :  { %v109_v45 = vmul.f32 0.6931472, %v162_v39 }
 0x11f   :  { %163 = vlog2.f32 %v107_v40 }
 0x120   :  { %v112_v50 = vmul.f32 %v109_v45, %v102_v44 }
 0x122   :  { %v114_v56 = vmul.f32 %v112_v50, %v90_v24 }
 0x124   :  { %v116_v60 = vadd.f32 %v114_v56, %v100_v59 }
 0x125   :  { %v164_v51 = vpop.eup %163 }
 0x126   :  { %v111_v54 = vmul.f32 0.6931472, %v164_v51 }
 0x128   :  { %v113_v55 = vmul.f32 %v111_v54, %v103_v49 }
 0x12a   :  { %v115_v58 = vmul.f32 %v113_v55, %v91_v35 }
 0x12c   :  { %v117_v61 = vadd.f32 %v115_v58, %v101_v57 }
 0x12e   :  { %v118_v62 = vadd.f32 %v117_v61, %v116_v60 }
 0x130   :  { %v119_v63 = vrot.slane %v118_v62, 4 }
 0x132   :  { %v120_v0 = vadd.f32 %v119_v63, %v118_v62 }
 0x134   :  { %v121_v1 = vrot.slane %v120_v0, 2 }
 0x136   :  { %v122_v2 = vadd.f32 %v121_v1, %v120_v0 }
 0x138   :  { %v123_v3 = vrot.slane %v122_v2, 1 }
 0x13a   :  { %v124_v4 = vadd.f32 %v123_v3, %v122_v2 }
 0x13c   :  { %125 = vst [vmem:[#allocation7] sm:$0xff] %v124_v4 }
 0x13d   :  { %136 = dma.vmem_to_hbm [thread:$0]  %s132_s1, 128, %s134_s23, [#allocation4]  }
 0x13e   :  { %241 = dma.done.wait [#allocation4], 128  }
 0x13f   :  { %242 = vsyncadd [#allocation4], 4294967168 }
 0x140   :  { %141 = vsyncpa [#allocation3], 1 }
 0x141   :  { %142 = vsyncpa [#allocation6], 1 }
 0x142   :  { %143 = vsyncpa [#allocation4], 1 }

</bundles_post_ra>
